<compile_context>
chip_gen: v7x
topology: tpu7x:2x2x1
jax: 0.10.0
libtpu: 0.0.40
codegen_flags: <defaults>
</compile_context>

<pallas_src>
import math

import jax
import jax.numpy as jnp
import numpy as np
from jax.experimental import pallas as pl
from jax.experimental.pallas import tpu as pltpu


# ----------------------------- kernel -------------------------------------- #
def _make_kernel(num_heads, head_dim, causal):
    H = num_heads * head_dim
    half = head_dim // 2

    def kernel(x_ref, wqkv_ref, wo_ref, cos_ref, sin_ref, o_ref):
        x = x_ref[0]                                   # (S, H) bf16
        S = x.shape[0]

        # Fused q/k/v projection: one bf16 MXU matmul, f32 accumulation.
        qkv = jnp.dot(x, wqkv_ref[...],
                      preferred_element_type=jnp.float32)        # (S, 3H) f32
        q = qkv[:, :H]            # attention scale already folded into weights
        k = qkv[:, H:2 * H]
        v = qkv[:, 2 * H:]

        # Gather heads: (S, H) -> (nh, S, hd).  O(S*H) data movement only.
        def split_heads(t):
            return jnp.stack(
                [t[:, h * head_dim:(h + 1) * head_dim] for h in range(num_heads)],
                axis=0)

        q3 = split_heads(q)                            # (nh, S, hd) f32
        k3 = split_heads(k)                            # (nh, S, hd) f32
        v3 = split_heads(v).astype(jnp.bfloat16)       # (nh, S, hd) bf16

        # RoPE in rotate-half form: weights were column-permuted on the host so
        # each head is laid out [evens | odds].  cos_ref is cos duplicated over
        # both halves; sin_ref has its first half negated, so the whole rotation
        # is t*cos + rotate_half(t)*sin_signed  (2 muls + 1 add per element).
        cos = cos_ref[...][None, :, :]                 # (1, S, hd) f32
        ssin = sin_ref[...][None, :, :]                # (1, S, hd) f32

        def rope(t3):
            t_rot = jnp.concatenate([t3[..., half:], t3[..., :half]], axis=-1)
            return t3 * cos + t_rot * ssin

        qr = rope(q3).astype(jnp.bfloat16)             # (nh, S, hd) bf16
        kr = rope(k3).astype(jnp.bfloat16)

        # Batched per-head scores on the MXU, f32 accumulation.
        scores = jnp.einsum('hqd,hkd->hqk', qr, kr,
                            preferred_element_type=jnp.float32)  # (nh, S, S)

        if causal:
            row = jax.lax.broadcasted_iota(jnp.int32, (S, S), 0)
            col = jax.lax.broadcasted_iota(jnp.int32, (S, S), 1)
            scores = jnp.where((col <= row)[None, :, :], scores, -1e30)

        # Softmax in f32; the divide is deferred until after the PV matmul.
        m = jnp.max(scores, axis=-1, keepdims=True)
        p = jnp.exp(scores - m)
        l = jnp.sum(p, axis=-1, keepdims=True)         # (nh, S, 1) f32

        o3 = jnp.einsum('hqk,hkd->hqd', p.astype(jnp.bfloat16), v3,
                        preferred_element_type=jnp.float32)      # (nh, S, hd)
        o3 = o3 * pl.reciprocal(l, approx=True)

        # Merge heads back: (nh, S, hd) -> (S, H).
        attn = jnp.concatenate([o3[h] for h in range(num_heads)], axis=-1)

        # Output projection.
        out = jnp.dot(attn.astype(jnp.bfloat16), wo_ref[...],
                      preferred_element_type=jnp.float32)
        o_ref[0] = out.astype(o_ref.dtype)

    return kernel


# ----------------------------- wrapper -------------------------------------- #
def llama_attention_pallas(x, wq, wk, wv, wo, cos_half, sin_half, *,
                           num_heads, head_dim, causal=True):
    """x: (B, S, H) f32; weights: (H, H) stored (in, out); cos/sin: (S, hd/2).
    Returns (B, S, H) f32."""
    B, S, H = x.shape
    assert num_heads * head_dim == H
    half = head_dim // 2
    assert cos_half.shape == (S, half) and sin_half.shape == (S, half)
    scale = 1.0 / math.sqrt(head_dim)

    # Host-side column permutation of wq / wk: within each head, reorder output
    # features as [0,2,4,..., 1,3,5,...] so in-kernel RoPE is a contiguous
    # rotate-half.  q.k^T is invariant to the shared permutation; v / wo keep
    # the original layout so the final output is unchanged.  The attention
    # scale is folded into the q columns (linear, commutes with RoPE).
    head_perm = np.concatenate([np.arange(0, head_dim, 2),
                                np.arange(1, head_dim, 2)])
    perm = np.concatenate([h * head_dim + head_perm for h in range(num_heads)])
    wq_p = jnp.asarray(wq)[:, perm] * scale
    wk_p = jnp.asarray(wk)[:, perm]

    # Fused (H, 3H) projection weight; bf16 MXU operands (f32 accumulation).
    wqkv_bf = jnp.concatenate([wq_p, wk_p, jnp.asarray(wv)], axis=1
                              ).astype(jnp.bfloat16)             # (H, 3H)
    wo_bf = jnp.asarray(wo).astype(jnp.bfloat16)
    x_bf = x.astype(jnp.bfloat16)

    # Full-width RoPE tables: cos duplicated over both halves; sin with the
    # first half negated ("signed"), so the kernel does t*cos + rot(t)*sin.
    cos_full = jnp.concatenate([cos_half, cos_half], axis=-1).astype(jnp.float32)
    sin_signed = jnp.concatenate([-sin_half, sin_half], axis=-1).astype(jnp.float32)

    kernel = _make_kernel(num_heads, head_dim, causal)

    const2d = lambda b: (0, 0)
    grid_spec = pltpu.PrefetchScalarGridSpec(
        num_scalar_prefetch=0,
        grid=(B,),
        in_specs=[
            pl.BlockSpec((1, S, H), lambda b: (b, 0, 0)),   # x
            pl.BlockSpec((H, 3 * H), const2d),              # fused wqkv (permuted)
            pl.BlockSpec((H, H), const2d),                  # wo
            pl.BlockSpec((S, head_dim), const2d),           # cos_full
            pl.BlockSpec((S, head_dim), const2d),           # sin_signed
        ],
        out_specs=pl.BlockSpec((1, S, H), lambda b: (b, 0, 0)),
    )

    flops = B * (8 * S * H * H + 4 * S * S * H)
    transcendentals = B * num_heads * S * S
    bytes_accessed = (B * S * H * 2            # x (bf16 in)
                      + B * S * H * 4          # out (f32)
                      + 4 * H * H * 2          # weights (bf16)
                      + 2 * S * head_dim * 4)  # cos/sin (f32)

    return pl.pallas_call(
        kernel,
        out_shape=jax.ShapeDtypeStruct((B, S, H), jnp.float32),
        grid_spec=grid_spec,
        compiler_params=pltpu.CompilerParams(
            dimension_semantics=("parallel",)),
        cost_estimate=pl.CostEstimate(
            flops=flops,
            transcendentals=transcendentals,
            bytes_accessed=bytes_accessed),
    )(x_bf, wqkv_bf, wo_bf, cos_full, sin_signed)


# ----------------------------- pure-JAX reference --------------------------- #
def llama_attention_ref(x, wq, wk, wv, wo, cos_half, sin_half, mask,
                        *, num_heads, head_dim):
    """Faithful f32 reference of the PyTorch module (interleaved RoPE)."""
    B, S, H = x.shape
    q = x @ wq
    k = x @ wk
    v = x @ wv
    q = q.reshape(B, S, num_heads, head_dim).transpose(0, 2, 1, 3)
    k = k.reshape(B, S, num_heads, head_dim).transpose(0, 2, 1, 3)
    v = v.reshape(B, S, num_heads, head_dim).transpose(0, 2, 1, 3)

    def rope(t):  # (B, nh, S, hd); cos/sin_half: (S, hd/2)
        te, to = t[..., 0::2], t[..., 1::2]
        re = te * cos_half - to * sin_half
        im = te * sin_half + to * cos_half
        return jnp.stack([re, im], axis=-1).reshape(t.shape)

    q, k = rope(q), rope(k)
    scores = jnp.einsum('bhqd,bhkd->bhqk', q, k,
                        precision=jax.lax.Precision.HIGHEST) / math.sqrt(head_dim)
    scores = scores + mask
    attn = jax.nn.softmax(scores, axis=-1)
    out = jnp.einsum('bhqk,bhkd->bhqd', attn, v,
                     precision=jax.lax.Precision.HIGHEST)
    out = out.transpose(0, 2, 1, 3).reshape(B, S, H)
    return out @ wo


# ----------------------------- main ----------------------------------------- #
if __name__ == "__main__":
    B, S = 2, 8
    num_heads, head_dim = 4, 8
    H = num_heads * head_dim  # hidden_size = 32

    key = jax.random.PRNGKey(0)
    kx, kq, kk, kv, ko = jax.random.split(key, 5)

    x = jax.random.normal(kx, (B, S, H), dtype=jnp.float32)
    wscale = 1.0 / math.sqrt(H)
    wq = jax.random.normal(kq, (H, H), dtype=jnp.float32) * wscale
    wk = jax.random.normal(kk, (H, H), dtype=jnp.float32) * wscale
    wv = jax.random.normal(kv, (H, H), dtype=jnp.float32) * wscale
    wo = jax.random.normal(ko, (H, H), dtype=jnp.float32) * wscale

    # standard LLaMA rotary frequencies: freqs_cis[s, i] = exp(i * s * theta_i)
    inv_freq = 1.0 / (10000.0 ** (np.arange(0, head_dim, 2, dtype=np.float32)
                                  / head_dim))                    # (hd/2,)
    angles = np.arange(S, dtype=np.float32)[:, None] * inv_freq[None, :]
    cos_half = jnp.asarray(np.cos(angles))                        # (S, hd/2)
    sin_half = jnp.asarray(np.sin(angles))                        # (S, hd/2)

    out = llama_attention_pallas(x, wq, wk, wv, wo, cos_half, sin_half,
                                 num_heads=num_heads, head_dim=head_dim,
                                 causal=True)
    out = jax.block_until_ready(out)

    # Reference uses the same causal additive mask the kernel applies in-kernel.
    mask = jnp.where(np.tril(np.ones((S, S), dtype=bool)), 0.0, -1e9
                     ).astype(jnp.float32)
    ref = llama_attention_ref(x, wq, wk, wv, wo, cos_half, sin_half, mask,
                              num_heads=num_heads, head_dim=head_dim)

    # Tolerance accounts for bf16 MXU operands vs the f32 reference
    # (accumulation, RoPE and softmax are f32 in the kernel).
    np.testing.assert_allclose(np.asarray(out), np.asarray(ref),
                               rtol=5e-2, atol=5e-2)
    print("KERNEL_OK")
</pallas_src>

<mosaic_0001>
module attributes {stable_mosaic.version = 11 : i64} {
  func.func @kernel(%arg0: i32, %arg1: memref<1x8x32xbf16, #tpu.memory_space<vmem>>, %arg2: memref<32x96xbf16, #tpu.memory_space<vmem>>, %arg3: memref<32x32xbf16, #tpu.memory_space<vmem>>, %arg4: memref<8x8xf32, #tpu.memory_space<vmem>>, %arg5: memref<8x8xf32, #tpu.memory_space<vmem>>, %arg6: memref<1x8x32xf32, #tpu.memory_space<vmem>>) attributes {dimension_semantics = [#tpu.dimension_semantics<parallel>], iteration_bounds = array<i64: 2>, scalar_prefetch = 0 : i64, scratch_operands = 0 : i64, tpu.core_type = #tpu.core_type<tc>, window_params = [{transform_indices = @transform_0, window_bounds = array<i64: 1, 8, 32>}, {pipeline_mode = #tpu.pipeline_mode<synchronous>, transform_indices = @transform_1, window_bounds = array<i64: 32, 96>}, {pipeline_mode = #tpu.pipeline_mode<synchronous>, transform_indices = @transform_2, window_bounds = array<i64: 32, 32>}, {pipeline_mode = #tpu.pipeline_mode<synchronous>, transform_indices = @transform_3, window_bounds = array<i64: 8, 8>}, {pipeline_mode = #tpu.pipeline_mode<synchronous>, transform_indices = @transform_4, window_bounds = array<i64: 8, 8>}, {transform_indices = @transform_5, window_bounds = array<i64: 1, 8, 32>}]} {
    %c0 = arith.constant 0 : index
    %c0_0 = arith.constant 0 : index
    %c0_1 = arith.constant 0 : index
    %0 = vector.load %arg1[%c0, %c0_0, %c0_1] : memref<1x8x32xbf16, #tpu.memory_space<vmem>>, vector<1x8x32xbf16>
    %1 = vector.shape_cast %0 : vector<1x8x32xbf16> to vector<8x32xbf16>
    %c0_2 = arith.constant 0 : index
    %c0_3 = arith.constant 0 : index
    %2 = vector.load %arg2[%c0_2, %c0_3] : memref<32x96xbf16, #tpu.memory_space<vmem>>, vector<32x96xbf16>
    %cst = arith.constant dense<0.000000e+00> : vector<8x96xf32>
    %3 = tpu.matmul %1, %2, %cst {dimension_numbers = #tpu.dot_dimension_numbers<[1], [0], [0], [1], [0, 0, 1, 1], [], []>} : vector<8x32xbf16>, vector<32x96xbf16>, vector<8x96xf32> -> vector<8x96xf32>
    %4 = vector.extract_strided_slice %3 {offsets = [0, 0], sizes = [8, 32], strides = [1, 1]} : vector<8x96xf32> to vector<8x32xf32>
    %5 = vector.extract_strided_slice %3 {offsets = [0, 32], sizes = [8, 32], strides = [1, 1]} : vector<8x96xf32> to vector<8x32xf32>
    %6 = vector.extract_strided_slice %3 {offsets = [0, 64], sizes = [8, 32], strides = [1, 1]} : vector<8x96xf32> to vector<8x32xf32>
    %7 = vector.extract_strided_slice %4 {offsets = [0, 0], sizes = [8, 8], strides = [1, 1]} : vector<8x32xf32> to vector<8x8xf32>
    %8 = vector.extract_strided_slice %4 {offsets = [0, 8], sizes = [8, 8], strides = [1, 1]} : vector<8x32xf32> to vector<8x8xf32>
    %9 = vector.extract_strided_slice %4 {offsets = [0, 16], sizes = [8, 8], strides = [1, 1]} : vector<8x32xf32> to vector<8x8xf32>
    %10 = vector.extract_strided_slice %4 {offsets = [0, 24], sizes = [8, 8], strides = [1, 1]} : vector<8x32xf32> to vector<8x8xf32>
    %11 = vector.shape_cast %7 : vector<8x8xf32> to vector<1x8x8xf32>
    %12 = vector.shape_cast %8 : vector<8x8xf32> to vector<1x8x8xf32>
    %13 = vector.shape_cast %9 : vector<8x8xf32> to vector<1x8x8xf32>
    %14 = vector.shape_cast %10 : vector<8x8xf32> to vector<1x8x8xf32>
    %15 = tpu.concatenate %11, %12, %13, %14 in 0 : vector<1x8x8xf32>, vector<1x8x8xf32>, vector<1x8x8xf32>, vector<1x8x8xf32> -> vector<4x8x8xf32>
    %16 = vector.extract_strided_slice %5 {offsets = [0, 0], sizes = [8, 8], strides = [1, 1]} : vector<8x32xf32> to vector<8x8xf32>
    %17 = vector.extract_strided_slice %5 {offsets = [0, 8], sizes = [8, 8], strides = [1, 1]} : vector<8x32xf32> to vector<8x8xf32>
    %18 = vector.extract_strided_slice %5 {offsets = [0, 16], sizes = [8, 8], strides = [1, 1]} : vector<8x32xf32> to vector<8x8xf32>
    %19 = vector.extract_strided_slice %5 {offsets = [0, 24], sizes = [8, 8], strides = [1, 1]} : vector<8x32xf32> to vector<8x8xf32>
    %20 = vector.shape_cast %16 : vector<8x8xf32> to vector<1x8x8xf32>
    %21 = vector.shape_cast %17 : vector<8x8xf32> to vector<1x8x8xf32>
    %22 = vector.shape_cast %18 : vector<8x8xf32> to vector<1x8x8xf32>
    %23 = vector.shape_cast %19 : vector<8x8xf32> to vector<1x8x8xf32>
    %24 = tpu.concatenate %20, %21, %22, %23 in 0 : vector<1x8x8xf32>, vector<1x8x8xf32>, vector<1x8x8xf32>, vector<1x8x8xf32> -> vector<4x8x8xf32>
    %25 = vector.extract_strided_slice %6 {offsets = [0, 0], sizes = [8, 8], strides = [1, 1]} : vector<8x32xf32> to vector<8x8xf32>
    %26 = vector.extract_strided_slice %6 {offsets = [0, 8], sizes = [8, 8], strides = [1, 1]} : vector<8x32xf32> to vector<8x8xf32>
    %27 = vector.extract_strided_slice %6 {offsets = [0, 16], sizes = [8, 8], strides = [1, 1]} : vector<8x32xf32> to vector<8x8xf32>
    %28 = vector.extract_strided_slice %6 {offsets = [0, 24], sizes = [8, 8], strides = [1, 1]} : vector<8x32xf32> to vector<8x8xf32>
    %29 = vector.shape_cast %25 : vector<8x8xf32> to vector<1x8x8xf32>
    %30 = vector.shape_cast %26 : vector<8x8xf32> to vector<1x8x8xf32>
    %31 = vector.shape_cast %27 : vector<8x8xf32> to vector<1x8x8xf32>
    %32 = vector.shape_cast %28 : vector<8x8xf32> to vector<1x8x8xf32>
    %33 = tpu.concatenate %29, %30, %31, %32 in 0 : vector<1x8x8xf32>, vector<1x8x8xf32>, vector<1x8x8xf32>, vector<1x8x8xf32> -> vector<4x8x8xf32>
    %34 = arith.truncf %33 : vector<4x8x8xf32> to vector<4x8x8xbf16>
    %c0_4 = arith.constant 0 : index
    %c0_5 = arith.constant 0 : index
    %35 = vector.load %arg4[%c0_4, %c0_5] : memref<8x8xf32, #tpu.memory_space<vmem>>, vector<8x8xf32>
    %36 = vector.shape_cast %35 : vector<8x8xf32> to vector<1x8x8xf32>
    %c0_6 = arith.constant 0 : index
    %c0_7 = arith.constant 0 : index
    %37 = vector.load %arg5[%c0_6, %c0_7] : memref<8x8xf32, #tpu.memory_space<vmem>>, vector<8x8xf32>
    %38 = vector.shape_cast %37 : vector<8x8xf32> to vector<1x8x8xf32>
    %39 = vector.extract_strided_slice %15 {offsets = [0, 0, 4], sizes = [4, 8, 4], strides = [1, 1, 1]} : vector<4x8x8xf32> to vector<4x8x4xf32>
    %40 = vector.extract_strided_slice %15 {offsets = [0, 0, 0], sizes = [4, 8, 4], strides = [1, 1, 1]} : vector<4x8x8xf32> to vector<4x8x4xf32>
    %41 = tpu.concatenate %39, %40 in 2 : vector<4x8x4xf32>, vector<4x8x4xf32> -> vector<4x8x8xf32>
    %42 = vector.broadcast %36 : vector<1x8x8xf32> to vector<4x8x8xf32>
    %43 = arith.mulf %15, %42 : vector<4x8x8xf32>
    %44 = vector.broadcast %38 : vector<1x8x8xf32> to vector<4x8x8xf32>
    %45 = arith.mulf %41, %44 : vector<4x8x8xf32>
    %46 = arith.addf %43, %45 : vector<4x8x8xf32>
    %47 = arith.truncf %46 : vector<4x8x8xf32> to vector<4x8x8xbf16>
    %48 = vector.extract_strided_slice %24 {offsets = [0, 0, 4], sizes = [4, 8, 4], strides = [1, 1, 1]} : vector<4x8x8xf32> to vector<4x8x4xf32>
    %49 = vector.extract_strided_slice %24 {offsets = [0, 0, 0], sizes = [4, 8, 4], strides = [1, 1, 1]} : vector<4x8x8xf32> to vector<4x8x4xf32>
    %50 = tpu.concatenate %48, %49 in 2 : vector<4x8x4xf32>, vector<4x8x4xf32> -> vector<4x8x8xf32>
    %51 = vector.broadcast %36 : vector<1x8x8xf32> to vector<4x8x8xf32>
    %52 = arith.mulf %24, %51 : vector<4x8x8xf32>
    %53 = vector.broadcast %38 : vector<1x8x8xf32> to vector<4x8x8xf32>
    %54 = arith.mulf %50, %53 : vector<4x8x8xf32>
    %55 = arith.addf %52, %54 : vector<4x8x8xf32>
    %56 = arith.truncf %55 : vector<4x8x8xf32> to vector<4x8x8xbf16>
    "tpu.trace_start"() <{level = 10 : i32, message = "hqd,hkd->hqk"}> : () -> ()
    %cst_8 = arith.constant dense<0.000000e+00> : vector<4x8x8xf32>
    %57 = tpu.matmul %47, %56, %cst_8 {dimension_numbers = #tpu.dot_dimension_numbers<[2], [2], [1], [1], [0, 0, 0, 1, 1, 1], [0], [0]>} : vector<4x8x8xbf16>, vector<4x8x8xbf16>, vector<4x8x8xf32> -> vector<4x8x8xf32>
    "tpu.trace_stop"() : () -> ()
    %58 = tpu.iota {dimensions = array<i32: 0>} : vector<8x8xi32>
    %59 = tpu.iota {dimensions = array<i32: 1>} : vector<8x8xi32>
    %60 = arith.cmpi sle, %59, %58 : vector<8x8xi32>
    %61 = vector.shape_cast %60 : vector<8x8xi1> to vector<1x8x8xi1>
    %cst_9 = arith.constant -1.000000e+30 : f32
    %62 = vector.shape_cast %61 : vector<1x8x8xi1> to vector<1x8x8xi1>
    %63 = vector.broadcast %62 : vector<1x8x8xi1> to vector<4x8x8xi1>
    %64 = vector.broadcast %cst_9 : f32 to vector<4x8x8xf32>
    %65 = arith.select %63, %57, %64 : vector<4x8x8xi1>, vector<4x8x8xf32>
    %cst_10 = arith.constant dense<0xFF800000> : vector<4x8xf32>
    %66 = vector.multi_reduction <maximumf>, %65, %cst_10 [2] : vector<4x8x8xf32> to vector<4x8xf32>
    %67 = vector.shape_cast %66 : vector<4x8xf32> to vector<4x8x1xf32>
    %68 = vector.broadcast %67 : vector<4x8x1xf32> to vector<4x8x8xf32>
    %69 = arith.subf %65, %68 : vector<4x8x8xf32>
    %70 = math.exp %69 : vector<4x8x8xf32>
    %cst_11 = arith.constant dense<0.000000e+00> : vector<4x8xf32>
    %71 = vector.multi_reduction <add>, %70, %cst_11 [2] : vector<4x8x8xf32> to vector<4x8xf32>
    %72 = vector.shape_cast %71 : vector<4x8xf32> to vector<4x8x1xf32>
    %73 = arith.truncf %70 : vector<4x8x8xf32> to vector<4x8x8xbf16>
    "tpu.trace_start"() <{level = 10 : i32, message = "hqk,hkd->hqd"}> : () -> ()
    %cst_12 = arith.constant dense<0.000000e+00> : vector<4x8x8xf32>
    %74 = tpu.matmul %73, %34, %cst_12 {dimension_numbers = #tpu.dot_dimension_numbers<[2], [1], [1], [2], [0, 0, 0, 1, 1, 2], [0], [0]>} : vector<4x8x8xbf16>, vector<4x8x8xbf16>, vector<4x8x8xf32> -> vector<4x8x8xf32>
    "tpu.trace_stop"() : () -> ()
    %75 = tpu.reciprocal %72 {approx = true} : vector<4x8x1xf32> -> vector<4x8x1xf32>
    %76 = vector.broadcast %75 : vector<4x8x1xf32> to vector<4x8x8xf32>
    %77 = arith.mulf %74, %76 : vector<4x8x8xf32>
    %78 = vector.extract_strided_slice %77 {offsets = [0, 0, 0], sizes = [1, 8, 8], strides = [1, 1, 1]} : vector<4x8x8xf32> to vector<1x8x8xf32>
    %79 = vector.shape_cast %78 : vector<1x8x8xf32> to vector<8x8xf32>
    %80 = vector.extract_strided_slice %77 {offsets = [1, 0, 0], sizes = [1, 8, 8], strides = [1, 1, 1]} : vector<4x8x8xf32> to vector<1x8x8xf32>
    %81 = vector.shape_cast %80 : vector<1x8x8xf32> to vector<8x8xf32>
    %82 = vector.extract_strided_slice %77 {offsets = [2, 0, 0], sizes = [1, 8, 8], strides = [1, 1, 1]} : vector<4x8x8xf32> to vector<1x8x8xf32>
    %83 = vector.shape_cast %82 : vector<1x8x8xf32> to vector<8x8xf32>
    %84 = vector.extract_strided_slice %77 {offsets = [3, 0, 0], sizes = [1, 8, 8], strides = [1, 1, 1]} : vector<4x8x8xf32> to vector<1x8x8xf32>
    %85 = vector.shape_cast %84 : vector<1x8x8xf32> to vector<8x8xf32>
    %86 = tpu.concatenate %79, %81, %83, %85 in 1 : vector<8x8xf32>, vector<8x8xf32>, vector<8x8xf32>, vector<8x8xf32> -> vector<8x32xf32>
    %87 = arith.truncf %86 : vector<8x32xf32> to vector<8x32xbf16>
    %c0_13 = arith.constant 0 : index
    %c0_14 = arith.constant 0 : index
    %88 = vector.load %arg3[%c0_13, %c0_14] : memref<32x32xbf16, #tpu.memory_space<vmem>>, vector<32x32xbf16>
    %cst_15 = arith.constant dense<0.000000e+00> : vector<8x32xf32>
    %89 = tpu.matmul %87, %88, %cst_15 {dimension_numbers = #tpu.dot_dimension_numbers<[1], [0], [0], [1], [0, 0, 1, 1], [], []>} : vector<8x32xbf16>, vector<32x32xbf16>, vector<8x32xf32> -> vector<8x32xf32>
    %c0_16 = arith.constant 0 : index
    %c0_17 = arith.constant 0 : index
    %c0_18 = arith.constant 0 : index
    %90 = vector.load %arg6[%c0_16, %c0_17, %c0_18] : memref<1x8x32xf32, #tpu.memory_space<vmem>>, vector<1x8x32xf32>
    %91 = vector.shape_cast %90 : vector<1x8x32xf32> to vector<8x32xf32>
    %92 = vector.shape_cast %89 : vector<8x32xf32> to vector<1x8x32xf32>
    tpu.vector_store %arg6[%c0_16, %c0_17, %c0_18], %92 {strides = array<i32>} : memref<1x8x32xf32, #tpu.memory_space<vmem>>, vector<1x8x32xf32>,
    return
  }
  func.func @transform_0(%arg0: i32) -> (i32, i32, i32) {
    %c0_i32 = arith.constant 0 : i32
    %c0_i32_0 = arith.constant 0 : i32
    %c0_i32_1 = arith.constant 0 : i32
    return %arg0, %c0_i32, %c0_i32_0 : i32, i32, i32
  }
  func.func @transform_1(%arg0: i32) -> (i32, i32) {
    %c0_i32 = arith.constant 0 : i32
    %c0_i32_0 = arith.constant 0 : i32
    %c0_i32_1 = arith.constant 0 : i32
    return %c0_i32, %c0_i32_0 : i32, i32
  }
  func.func @transform_2(%arg0: i32) -> (i32, i32) {
    %c0_i32 = arith.constant 0 : i32
    %c0_i32_0 = arith.constant 0 : i32
    %c0_i32_1 = arith.constant 0 : i32
    return %c0_i32, %c0_i32_0 : i32, i32
  }
  func.func @transform_3(%arg0: i32) -> (i32, i32) {
    %c0_i32 = arith.constant 0 : i32
    %c0_i32_0 = arith.constant 0 : i32
    %c0_i32_1 = arith.constant 0 : i32
    return %c0_i32, %c0_i32_0 : i32, i32
  }
  func.func @transform_4(%arg0: i32) -> (i32, i32) {
    %c0_i32 = arith.constant 0 : i32
    %c0_i32_0 = arith.constant 0 : i32
    %c0_i32_1 = arith.constant 0 : i32
    return %c0_i32, %c0_i32_0 : i32, i32
  }
  func.func @transform_5(%arg0: i32) -> (i32, i32, i32) {
    %c0_i32 = arith.constant 0 : i32
    %c0_i32_0 = arith.constant 0 : i32
    %c0_i32_1 = arith.constant 0 : i32
    return %arg0, %c0_i32, %c0_i32_0 : i32, i32, i32
  }
}

</mosaic_0001>

<bundles_post_ra>
// kernel: tpu_custom_call.1
= control target key start
LH: loop header
LB: loop body
LE: loop exit
PB: predicated region body
PF: predicated region fallthrough
CT: control target
= control target key end

     0   :  { %10 = vsyncpa [#allocation3], 0  ;;  %s1985_s0 = inlined_call_operand.hbm [shape: bf16[2,8,32], index: 0, kind: input, shape index: {}]   ;;  %s1986_s1 = inlined_call_operand.hbm [shape: bf16[32,96], index: 1, kind: input, shape index: {}]   ;;  %s1987_s2 = inlined_call_operand.hbm [shape: bf16[32,32], index: 2, kind: input, shape index: {}]   ;;  %s1988_s3 = inlined_call_operand.vmem [shape: f32[8,8], index: 3, kind: input, shape index: {}]   ;;  %s1989_s4 = inlined_call_operand.hbm [shape: f32[8,8], index: 4, kind: input, shape index: {}]   ;;  %s1990_s5 = inlined_call_operand.hbm [shape: f32[2,8,32], index: 5, kind: output, shape index: {}]  }
   0x1   :  { %12 = vsyncpa [#allocation3 + $0x1], 0 }
   0x2   :  { %13 = vsyncpa [#allocation6], 0 }
   0x3   :  { %14 = vsyncpa [#allocation9], 0 }
   0x4   :  { %15 = vsyncpa [#allocation4], 0 }
   0x5   :  { %17 = vsyncpa [#allocation4 + $0x1], 0  ;;  %s1587_s18 = smov 0   ;;  %s1589_s19 = smov 0  }
   0x6   :  { %s1591_s20 = smov 0   ;;  %s1593_s21 = smov 0  }
   0x7 LB: > { %s1608_s22 = sadd.s32 4294967295, %s1533_s21   ;;  %s1113_s23 = sadd.s32 4294967294, %s1533_s21   ;;  %s1533_s21 = sphi %s1593_s21, %s2013_s21   ;;  %s1529_s20 = sphi %s1591_s20, %s2012_s20   ;;  %s1525_s19 = sphi %s1589_s19, %s2011_s19   ;;  %s1521_s18 = sphi %s1587_s18, %s2010_s18  }
   0x8   : > { %p43_p0 = scmp.ne.s32.totalorder %s1525_s19, %s1521_s18  ;;  %p1991_p1 = scmp.eq.s32.totalorder %s1608_s22, 0 }
   0x9   : > { %p157_p3 = scmp.eq.s32.totalorder %s1113_s23, 1  ;;  %p1114_p5 = scmp.ge.s32.totalorder %s1533_s21, 1 }
   0xa   : > { %p1617_p4 = por %p1991_p1, %p43_p0  ;;  %p164_p7 = scmp.lt.s32.totalorder %s1533_s21, 3 }
   0xb   : > { %p1622_p6 = por %p157_p3, %p43_p0  ;;  %s1535_s27 = smov [#allocation5]  }
   0xc   : > { %s1994_s24 = scalar_select %p1617_p4, 1, 0 }
   0xd   : > { %s1995_s25 = scalar_select %p1622_p6, 1, 0 }
   0xe   : > { %p1627_p8 = pnand %p1114_p5, %p164_p7  ;;  %s176_s28 = sshll.u32 %s1535_s27, 4  ;;  %s1631_s28 = int_to_ptr.vmem [resolvable:$true] %s176_s28 }
   0xf   : > { %s1536_s30 = smov [#allocation7]   ;;  %s1537_s7 = smov [#allocation8]  }
  0x10   : > { %s1996_s26 = scalar_select %p1627_p8, 1, 0 }
  0x11   : > { %p1247_p9 = pneg %p1627_p8  ;;  %s189_s6 = sshll.u32 %s1536_s30, 4  ;;  %s1642_s6 = int_to_ptr.vmem [resolvable:$true] %s189_s6 }
  0x12   : > { %s1644_s8 = sshll.u32 %s1537_s7, 4  ;;  %s1345_s11 = scalar_lea.hbm %s1986_s1, 256  ;;  %s207_s8 = int_to_ptr.vmem [resolvable:$true] %s1644_s8 }
  0x13   : > { %p1638_p11 = pnand %p1247_p9, %p1991_p1  ;;  %p1346_p12 = scmp.ne.s32.totalorder %s1986_s1, %s1345_s11 }
  0x14   : > { %p1352_p5 = scmp.lt.u32.totalorder %s1345_s11, %s1986_s1 }
  0x15   : > { %p1654_p13 = pneg %p1638_p11 }
  0x17   : > { %p1348_p0 = pnand %p1654_p13, %p1346_p12 }
  0x19   : > { %p1349_p3 = pneg %p1348_p0 }
  0x1b   : > { %p1354_p7 = pnand %p1352_p5, %p1349_p3 }
  0x1d   : > { %1357 = shalt.err (!%p1354_p7)
}
  0x1e   : > { %s1358_s17 = scalar_lea.vmem %s1631_s28, 256  ;;  %p1366_p2 = scmp.lt.s32.totalorder %s1631_s28, %s1631_s28 }
  0x1f   : > { %p1359_p9 = scmp.ne.s32.totalorder %s1631_s28, %s1358_s17  ;;  %p1367_p6 = scmp.lt.s32.totalorder %s1358_s17, %s1358_s17 }
  0x21   : > { %p1361_p10 = pnand %p1359_p9, %p1654_p13  ;;  %p1368_p12 = por %p1367_p6, %p1366_p2 }
  0x23   : > { %p1362_p1 = pneg %p1361_p10 }
  0x25   : > { %p1369_p0 = pnand %p1368_p12, %p1362_p1 }
  0x27   : > { %1372 = shalt.err (!%p1369_p0)
}
  0x28   : > { %s1538_s23 = smov 64   ;;  %s1539_s27 = smov 4  }
  0x29   : > { %1250 = dma.hbm_to_vmem [thread:$0]  (!%p1638_p11), %s1986_s1, 256, %s1631_s28, [#allocation6], %s1538_s23, %s1538_s23, %s1539_s27  }
  0x2a   : > { %s1373_s11 = scalar_lea.hbm %s1987_s2, 256 }
  0x2b   : > { %p1374_p2 = scmp.ne.s32.totalorder %s1987_s2, %s1373_s11  ;;  %p1380_p10 = scmp.lt.u32.totalorder %s1373_s11, %s1987_s2 }
  0x2d   : > { %p1376_p1 = pnand %p1374_p2, %p1654_p13 }
  0x2f   : > { %p1377_p6 = pneg %p1376_p1 }
  0x31   : > { %p1382_p3 = pnand %p1380_p10, %p1377_p6 }
  0x33   : > { %1385 = shalt.err (!%p1382_p3)
}
  0x34   : > { %s1386_s28 = scalar_lea.vmem %s1642_s6, 256  ;;  %p1394_p12 = scmp.lt.s32.totalorder %s1642_s6, %s1642_s6 }
  0x35   : > { %p1387_p5 = scmp.ne.s32.totalorder %s1642_s6, %s1386_s28  ;;  %p1395_p0 = scmp.lt.s32.totalorder %s1386_s28, %s1386_s28 }
  0x37   : > { %p1389_p7 = pnand %p1387_p5, %p1654_p13  ;;  %p1396_p2 = por %p1395_p0, %p1394_p12 }
  0x39   : > { %p1390_p9 = pneg %p1389_p7 }
  0x3b   : > { %p1397_p1 = pnand %p1396_p2, %p1390_p9 }
  0x3d   : > { %1400 = shalt.err (!%p1397_p1)
}
  0x3e   : > { %1253 = dma.hbm_to_vmem [thread:$0]  (!%p1638_p11), %s1987_s2, 256, %s1642_s6, [#allocation6], %s1538_s23, %s1538_s23, %s1539_s27  }
  0x3f   : > { %s1401_s10 = scalar_lea.hbm %s1989_s4, 128 }
  0x40   : > { %p1402_p6 = scmp.ne.s32.totalorder %s1989_s4, %s1401_s10  ;;  %p1408_p5 = scmp.lt.u32.totalorder %s1401_s10, %s1989_s4 }
  0x42   : > { %p1404_p10 = pnand %p1402_p6, %p1654_p13 }
  0x44   : > { %p1405_p3 = pneg %p1404_p10 }
  0x46   : > { %p1410_p7 = pnand %p1408_p5, %p1405_p3 }
  0x48   : > { %1413 = shalt.err (!%p1410_p7)
}
  0x49   : > { %s1414_s16 = scalar_lea.vmem %s207_s8, 128  ;;  %p1422_p2 = scmp.lt.s32.totalorder %s207_s8, %s207_s8 }
  0x4a   : > { %p1415_p9 = scmp.ne.s32.totalorder %s207_s8, %s1414_s16  ;;  %p1423_p1 = scmp.lt.s32.totalorder %s1414_s16, %s1414_s16 }
  0x4c   : > { %p1417_p12 = pnand %p1415_p9, %p1654_p13  ;;  %p1424_p4 = por %p1423_p1, %p1422_p2 }
  0x4e   : > { %p1418_p0 = pneg %p1417_p12 }
  0x50   : > { %p1425_p8 = pnand %p1424_p4, %p1418_p0 }
  0x52   : > { %1428 = shalt.err (!%p1425_p8)
}
  0x53   : > { %1256 = dma.hbm_to_vmem [thread:$0]  (!%p1638_p11), %s1989_s4, 128, %s207_s8, [#allocation9]  }
  0x54   : > { %s1718_s14 = sadd.s32 1, %s1533_s21   ;;  %s30_s29 = sadd.s32 1, %s1529_s20 }
  0x55   : > { %s27_s27 = ssub.s32 %s1533_s21, %s1718_s14  ;;  %p37_p8 = scmp.ne.s32.totalorder %s1529_s20, %s1525_s19 }
  0x56   : > { %p28_p4 = scmp.eq.s32.totalorder %s27_s27, 0  ;;  %p38_p13 = scmp.eq.s32.totalorder %s1533_s21, 0 }
  0x57   : > { %p1268_p6 = scmp.lt.s32.totalorder %s1533_s21, 2  ;;  %p1999_p3 = scmp.eq.s32.totalorder %s1608_s22, 1 }
  0x58   : > { %s1728_s28 = scalar_select %p28_p4, %s1529_s20, %s30_s29  }
  0x59   : > { %p39_p10 = por %p38_p13, %p37_p8  ;;  %p1732_p5 = por %p1999_p3, %p37_p8 }
  0x5a   : > { %s217_s30 = sand.u32 1, %s1529_s20   ;;  %s1120_s7 = sshll.u32 %s1533_s21, 6 }
  0x5b   : > { %s1119_s8 = sshll.u32 %s217_s30, 2  ;;  %s1741_s11 = scalar_lea.hbm %s1985_s0, %s1120_s7 }
  0x5c   : > { %s221_s12 = scalar_lea.vmem [#allocation2], %s1119_s8  ;;  %p1743_p11 = pnand %p1268_p6, %p39_p10 }
  0x5d   : > { %s228_s13 = sshll.u32 %s221_s12, 4  ;;  %s218_s16 = scalar_lea.sflag [#allocation3], %s217_s30  ;;  %s1747_s13 = int_to_ptr.vmem [resolvable:$true] %s228_s13 }
  0x5e   : > { %s1429_s6 = scalar_lea.hbm %s1741_s11, 64  ;;  %p1431_p9 = pneg %p1743_p11 }
  0x5f   : > { %p1430_p7 = scmp.ne.s32.totalorder %s1741_s11, %s1429_s6  ;;  %s1434_s29 = scalar_lea.hbm %s1985_s0, 128 }
  0x60   : > { %p1435_p2 = scmp.lt.u32.totalorder %s1741_s11, %s1985_s0  ;;  %p1436_p1 = scmp.lt.u32.totalorder %s1434_s29, %s1429_s6 }
  0x61   : > { %p1432_p12 = pnand %p1431_p9, %p1430_p7  ;;  %p1438_p8 = scmp.lt.u32.totalorder %s1429_s6, %s1741_s11 }
  0x62   : > { %p1437_p4 = por %p1436_p1, %p1435_p2 }
  0x63   : > { %p1433_p0 = pneg %p1432_p12 }
  0x64   : > { %p1439_p13 = por %p1438_p8, %p1437_p4 }
  0x66   : > { %p1440_p6 = pnand %p1439_p13, %p1433_p0 }
  0x68   : > { %1443 = shalt.err (!%p1440_p6)
}
  0x69   : > { %s1444_s30 = scalar_lea.vmem %s1747_s13, 64  ;;  %s1540_s9 = smov [#allocation2]  }
  0x6a   : > { %p1445_p10 = scmp.ne.s32.totalorder %s1747_s13, %s1444_s30  ;;  %s1449_s10 = sshll.u32 %s1540_s9, 4  ;;  %s1450_s10 = int_to_ptr.vmem [resolvable:$false] %s1449_s10 }
  0x6b   : > { %s1451_s12 = scalar_lea.vmem %s1450_s10, 128  ;;  %p1452_p12 = scmp.lt.s32.totalorder %s1747_s13, %s1450_s10 }
  0x6c   : > { %p1447_p3 = pnand %p1445_p10, %p1431_p9  ;;  %p1453_p2 = scmp.lt.s32.totalorder %s1451_s12, %s1444_s30 }
  0x6e   : > { %p1448_p7 = pneg %p1447_p3  ;;  %p1454_p1 = por %p1453_p2, %p1452_p12 }
  0x70   : > { %p1455_p4 = pnand %p1454_p1, %p1448_p7 }
  0x72   : > { %1458 = shalt.err (!%p1455_p4)
}
  0x73   : > { %1260 = dma.hbm_to_vmem [thread:$0]  (!%p1743_p11), %s1741_s11, 64, %s1747_s13, %s218_s16  }
  0x74   : > { %p2002_p0 = scmp.ne.s32.totalorder %s1996_s26, 0 }
  0x75   : > { %s1777_s6 = sand.u32 (!%p2002_p0), 1, %s1525_s19   ;;  %p2003_p9 = scmp.ne.s32.totalorder (!%p2002_p0), %s1994_s24, 0 }
  0x76   : > { %237 = sbr.rel (%p2002_p0) target bundleno = 1772 (0x6ec), region = 40  ;;  %s1122_s23 = sshll.u32 (!%p2002_p0), %s1777_s6, 2 }
  0x77   : > { %s240_s27 = scalar_lea.sflag (!%p2002_p0), [#allocation3], %s1777_s6  ;;  %s243_s29 = scalar_lea.vmem (!%p2002_p0), [#allocation2], %s1122_s23 }
  0x7d   : > { %1504 = dma.done.wait (%p2003_p9), %s240_s27, 64  }
  0x7e   : > { %1506 = vsyncadd (%p2003_p9), %s240_s27, 4294967232  ;;  %p2004_p8 = scmp.eq.s32.totalorder %s1608_s22, 0 }
  0x80   : > { %1508 = dma.done.wait (%p2004_p8), [#allocation6], 512   ;;  %p2005_p11 = pmov %p2004_p8 }
  0x81   : > { %p2006_p13 = pmov %p2004_p8 }
  0x82   : > { %1510 = vsyncadd (%p2005_p11), [#allocation6], 4294966784 }
  0x83   : > { %1512 = dma.done.wait (%p2006_p13), [#allocation9], 128   ;;  %p2007_p6 = pmov %p2004_p8 }
  0x84   : > { %v1541_v0 = vmov 0.0   ;;  %vm1542_vm0 = vmmov 0   ;;  %v1325_v1 = vld [vmem:[#allocation5] sm:$0xff]   ;;  %v1326_v2 = vld [vmem:[#allocation5 + $0x8] sm:$0xff]   ;;  %v283_v3 = vld [vmem:[%s243_s29] sm:$0xf] }
  0x85   : > { %1514 = vsyncadd (%p2007_p6), [#allocation9], 4294967168  ;;  %1167 = vmatprep.subr.bf16.mxu0 %v1541_v0  ;;  %1171 = vmatprep.mubr.msk.bf16.mxu0 %vm1542_vm0, %v1541_v0  ;;  %vm300_vm1 = vcmask 261120   ;;  %s1543_s24 = smov 104   ;;  %s1544_s26 = smov 120   ;;  %vm384_vm2 = vcmask 31744  }
  0x86   : > { %1175 = vmatprep.subr.bf16.mxu1 %v1541_v0  ;;  %1177 = vmatprep.mubr.msk.bf16.mxu1 %vm1542_vm0, %v1541_v0  ;;  %s1545_s11 = smov 92   ;;  %s1546_s13 = smov 112   ;;  %v1821_v11 = vld [vmem:[#allocation8] sm:$0xff]  ;;  %v1830_v16 = vld [vmem:[%s1988_s3] sm:$0xff]  ;;  %vm472_vm3 = vcmask 64512   ;;  %vm723_vm4 = vcmask 1043456  }
  0x87   : > { %1168 = vmatpush3.bf16.msra.mxu0 %v1325_v1  ;;  %s1547_s15 = smov 100   ;;  %s1548_s8 = smov 32   ;;  %vm935_vm6 = vcmask 130048   ;;  %vm937_vm7 = vcmask 195584  }
  0x88   : > { %1169 = vmatprep.subr.bf16.mxu0 %v1541_v0  ;;  %s1549_s30 = smov 4   ;;  %s1550_s9 = smov 124  }
  0x89   : > { %s1551_s10 = smov 96   ;;  %s1552_s12 = smov 64  }
  0x8a   : > { %s1553_s23 = smov 8   ;;  %s1554_s27 = smov 16  }
  0x8b   : > { %1170 = vmatpush3.bf16.msra.mxu0 %v1326_v2  ;;  %s1555_s29 = smov 24  }
  0x8c   : > { %1181 = vmatprep.subr.bf16.mxu0 %v1541_v0 }
  0x8e   : > { %1172 = vmatmul.mubr.msk.bf16.vlgmr.msra.gmra.mrb[0].mxu0 %vm300_vm1, %v283_v3 }
  0x8f   : > { %1183 = vmatprep.mubr.msk.bf16.mxu0 %vm1542_vm0, %v1541_v0 }
 0x161   : > { %v1804_v4 = vpop.f32.mrb[0].mxu0 }
 0x162   : > { %351 = vrot.lane.b32.xlu1 %v1804_v4, %s1543_s24  ;;  %345 = vrot.lane.b32.xlu0 %v1804_v4, %s1544_s26  ;;  %v1173_v5 = vpop.f32.mrb[1].mxu0  ;;  %v389_v52 = vmul.f32 %v1830_v16, %v1804_v4  ;;  %v354_v55 = vpack.c.bf16 %v1804_v4, %v1804_v4  ;;  %s1126_s24 = sshll.u32 %s1777_s6, 3  ;;  %s1142_s26 = sshll.u32 %s1608_s22, 7 }
 0x163   : > { %v341_v6 = vpop.f32.mrb[2].mxu0  ;;  %s1940_s7 = scalar_lea.hbm %s1990_s5, %s1142_s26  ;;  %s1556_s22 = smov [#allocation10]  }
 0x164   : > { %v1174_v7 = vpop.f32.mrb[3].mxu0 }
 0x166   : > { %405 = vrot.lane.b32.xlu1 %v1804_v4, %s1545_s11  ;;  %348 = vrot.lane.b32.xlu0 %v1804_v4, %s1546_s13 }
 0x16a   : > { %417 = vrot.lane.b32.xlu0 %v1804_v4, %s1547_s15 }
 0x1d4   : > { %v1811_v8 = vpop.permute.xlu0 %345  ;;  %v1815_v9 = vpop.permute.xlu1 %351 }
 0x1d5   : > { %419 = vrot.lane.b32.xlu0 %v1811_v8, %s1547_s15  ;;  %407 = vrot.lane.b32.xlu1 %v1811_v8, %s1545_s11  ;;  %v390_v62 = vmul.f32 %v1830_v16, %v1811_v8 }
 0x1d8   : > { %v1817_v10 = vpop.permute.xlu0 %348  ;;  %v406_v12 = vpop.permute.xlu1 %405 }
 0x1d9   : > { %421 = vrot.lane.b32.xlu0 %v1817_v10, %s1547_s15  ;;  %409 = vrot.lane.b32.xlu1 %v1817_v10, %s1545_s11  ;;  %v391_v6 = vmul.f32 %v1830_v16, %v1817_v10 }
 0x1dc   : > { %v418_v13 = vpop.permute.xlu0 %417 }
 0x1dd   : > { %v429_v14 = vsel %vm384_vm2, %v406_v12, %v418_v13  ;;  %423 = vrot.lane.b32.xlu0 %v1815_v9, %s1547_s15  ;;  %411 = vrot.lane.b32.xlu1 %v1815_v9, %s1545_s11  ;;  %s281_s11 = scalar_lea.vmem [#allocation10], %s1126_s24 }
 0x1de   : > { %v441_v15 = vmul.f32 %v429_v14, %v1821_v11  ;;  %s1014_s13 = sshll.u32 %s281_s11, 4  ;;  %s1942_s13 = int_to_ptr.vmem [resolvable:$true] %s1014_s13 }
 0x1e1   : > { %434 = vrot.lane.b32.xlu1 %v1830_v16, %s1548_s8  ;;  %449 = vrot.lane.b32.xlu0 %v441_v15, %s1548_s8 }
 0x247   : > { %v408_v17 = vpop.permute.xlu1 %407  ;;  %v420_v18 = vpop.permute.xlu0 %419 }
 0x248   : > { %v430_v19 = vsel %vm384_vm2, %v408_v17, %v420_v18 }
 0x249   : > { %v442_v20 = vmul.f32 %v430_v19, %v1821_v11 }
 0x24b   : > { %v410_v21 = vpop.permute.xlu1 %409  ;;  %451 = vrot.lane.b32.xlu1 %v442_v20, %s1548_s8  ;;  %v422_v22 = vpop.permute.xlu0 %421 }
 0x24c   : > { %v431_v23 = vsel %vm384_vm2, %v410_v21, %v422_v22  ;;  %v392_v21 = vmul.f32 %v1830_v16, %v1815_v9  ;;  %v666_v16 = vlaneseq }
 0x24d   : > { %v443_v24 = vmul.f32 %v431_v23, %v1821_v11 }
 0x24f   : > { %v412_v25 = vpop.permute.xlu1 %411  ;;  %453 = vrot.lane.b32.xlu0 %v443_v24, %s1548_s8  ;;  %v424_v26 = vpop.permute.xlu0 %423 }
 0x250   : > { %v432_v27 = vsel %vm384_vm2, %v412_v25, %v424_v26 }
 0x251   : > { %v444_v28 = vmul.f32 %v432_v27, %v1821_v11  ;;  %v667_v27 = vshrl.u32 %v666_v16, 7 }
 0x253   : > { %v435_v29 = vpop.permute.xlu1 %434  ;;  %372 = vrot.lane.b32.xlu0 %v1804_v4, %s1549_s30  ;;  %455 = vrot.lane.b32.xlu1 %v444_v28, %s1548_s8  ;;  %v450_v31 = vpop.permute.xlu0 %449  ;;  %s1001_s8 = scalar_lea.sflag [#allocation4], %s1777_s6 }
 0x254   : > { %v437_v30 = vmul.f32 %v435_v29, %v1804_v4  ;;  %v438_v34 = vmul.f32 %v435_v29, %v1811_v8  ;;  %v439_v38 = vmul.f32 %v435_v29, %v1817_v10  ;;  %v440_v42 = vmul.f32 %v435_v29, %v1815_v9 }
 0x256   : > { %v461_v32 = vadd.f32 %v450_v31, %v437_v30 }
 0x257   : > { %362 = vrot.lane.b32.xlu0 %v1811_v8, %s1550_s9  ;;  %360 = vrot.lane.b32.xlu1 %v1804_v4, %s1550_s9 }
 0x258   : > { %v465_v33 = vpack.c.bf16 %v461_v32, %v461_v32 }
 0x25b   : > { %374 = vrot.lane.b32.xlu1 %v1811_v8, %s1549_s30  ;;  %470 = vrot.lane.b32.xlu0 %v465_v33, %s1551_s10 }
 0x25f   : > { %376 = vrot.lane.b32.xlu0 %v1817_v10, %s1549_s30 }
 0x2bd   : > { %v452_v35 = vpop.permute.xlu1 %451 }
 0x2be   : > { %v462_v36 = vadd.f32 %v452_v35, %v438_v34 }
 0x2c0   : > { %v466_v37 = vpack.c.bf16 %v462_v36, %v462_v36 }
 0x2c1   : > { %v454_v39 = vpop.permute.xlu0 %453 }
 0x2c2   : > { %v463_v40 = vadd.f32 %v454_v39, %v439_v38  ;;  %520 = vrot.lane.b32.xlu1 %v466_v37, %s1551_s10 }
 0x2c4   : > { %v467_v41 = vpack.c.bf16 %v463_v40, %v463_v40 }
 0x2c5   : > { %v456_v43 = vpop.permute.xlu1 %455  ;;  %v373_v44 = vpop.permute.xlu0 %372 }
 0x2c6   : > { %v464_v45 = vadd.f32 %v456_v43, %v440_v42  ;;  %364 = vrot.lane.b32.xlu1 %v1817_v10, %s1550_s9  ;;  %569 = vrot.lane.b32.xlu0 %v467_v41, %s1551_s10 }
 0x2c8   : > { %v468_v46 = vpack.c.bf16 %v464_v45, %v464_v45 }
 0x2c9   : > { %v361_v47 = vpop.permute.xlu1 %360  ;;  %v363_v48 = vpop.permute.xlu0 %362 }
 0x2ca   : > { %v385_v49 = vsel %vm384_vm2, %v361_v47, %v373_v44  ;;  %618 = vrot.lane.b32.xlu1 %v468_v46, %s1551_s10  ;;  %366 = vrot.lane.b32.xlu0 %v1815_v9, %s1550_s9  ;;  %s1463_s9 = sshll.u32 %s1556_s22, 4  ;;  %s1464_s9 = int_to_ptr.vmem [resolvable:$false] %s1463_s9 }
 0x2cb   : > { %v393_v50 = vmul.f32 %v385_v49, %v1821_v11  ;;  %s1465_s10 = scalar_lea.vmem %s1464_s9, 256  ;;  %p1466_p12 = scmp.lt.s32.totalorder %s1942_s13, %s1464_s9 }
 0x2cd   : > { %v471_v51 = vpop.permute.xlu0 %470  ;;  %v397_v54 = vadd.f32 %v393_v50, %v389_v52  ;;  %v375_v57 = vpop.permute.xlu1 %374  ;;  %v356_v52 = vpack.c.bf16 %v1817_v10, %v1817_v10 }
 0x2ce   : > { %378 = vrot.lane.b32.xlu1 %v1815_v9, %s1549_s30  ;;  %v477_v53 = vsel %vm472_vm3, %v471_v51, 0  ;;  %v386_v58 = vsel %vm384_vm2, %v363_v48, %v375_v57  ;;  %s1459_s30 = scalar_lea.vmem %s1942_s13, 128 }
 0x2cf   : > { %1176 = vmatpush3.bf16.xpose.msra.mxu1 %v477_v53  ;;  %v401_v56 = vpack.c.bf16 %v397_v54, %v397_v54  ;;  %v394_v59 = vmul.f32 %v386_v58, %v1821_v11  ;;  %v357_v53 = vpack.c.bf16 %v1815_v9, %v1815_v9  ;;  %v355_v54 = vpack.c.bf16 %v1811_v8, %v1811_v8  ;;  %p1460_p10 = scmp.ne.s32.totalorder %s1942_s13, %s1459_s30  ;;  %p1467_p2 = scmp.lt.s32.totalorder %s1465_s10, %s1459_s30 }
 0x2d0   : > { %1187 = vmatprep.subr.bf16.mxu1 %v1541_v0 }
 0x2d1   : > { %v377_v60 = vpop.permute.xlu0 %376  ;;  %v398_v1 = vadd.f32 %v394_v59, %v390_v62  ;;  %p1461_p3 = pnand %p1460_p10, %p1732_p5  ;;  %p1468_p1 = por %p1467_p2, %p1466_p12 }
 0x2d2   : > { %718 = vrot.lane.b32.xlu1 %v354_v55, %s1552_s12 }
 0x2d3   : > { %v402_v12 = vpack.c.bf16 %v398_v1, %v398_v1  ;;  %p1462_p7 = pneg %p1461_p3 }
 0x2d5   : > { %p1469_p4 = pnand %p1468_p1, %p1462_p7 }
 0x2d6   : > { %1178 = vmatmul.mubr.msk.bf16.vlgmr.msra.gmra.mrb[0].mxu1 %vm472_vm3, %v401_v56 }
 0x2d7   : > { %1189 = vmatprep.mubr.msk.bf16.mxu1 %vm1542_vm0, %v1541_v0 }
 0x334   : > { %v521_v61 = vpop.permute.xlu1 %520 }
 0x335   : > { %v526_v63 = vsel %vm472_vm3, %v521_v61, 0 }
 0x336   : > { %1182 = vmatpush3.bf16.xpose.msra.mxu0 %v526_v63 }
 0x337   : > { %1193 = vmatprep.subr.bf16.mxu0 %v1541_v0 }
 0x338   : > { %v365_v2 = vpop.permute.xlu1 %364  ;;  %v570_v3 = vpop.permute.xlu0 %569 }
 0x339   : > { %v387_v4 = vsel %vm384_vm2, %v365_v2, %v377_v60  ;;  %v575_v5 = vsel %vm472_vm3, %v570_v3, 0 }
 0x33a   : > { %v395_v7 = vmul.f32 %v387_v4, %v1821_v11  ;;  %1188 = vmatpush3.bf16.xpose.msra.mxu1 %v575_v5 }
 0x33b   : > { %1199 = vmatprep.subr.bf16.mxu1 %v1541_v0 }
 0x33c   : > { %v399_v13 = vadd.f32 %v395_v7, %v391_v6  ;;  %v619_v14 = vpop.permute.xlu1 %618  ;;  %v367_v18 = vpop.permute.xlu0 %366 }
 0x33d   : > { %v624_v15 = vsel %vm472_vm3, %v619_v14, 0  ;;  %1184 = vmatmul.mubr.msk.bf16.vlgmr.msra.gmra.mrb[4].mxu0 %vm472_vm3, %v402_v12 }
 0x33e   : > { %v403_v17 = vpack.c.bf16 %v399_v13, %v399_v13  ;;  %1194 = vmatpush3.bf16.xpose.msra.mxu0 %v624_v15  ;;  %1195 = vmatprep.mubr.msk.bf16.mxu0 %vm1542_vm0, %v1541_v0 }
 0x33f   : > { %1205 = vmatprep.subr.bf16.mxu0 %v1541_v0 }
 0x340   : > { %v379_v19 = vpop.permute.xlu1 %378 }
 0x341   : > { %v388_v20 = vsel %vm384_vm2, %v367_v18, %v379_v19  ;;  %1190 = vmatmul.mubr.msk.bf16.vlgmr.msra.gmra.mrb[4].mxu1 %vm472_vm3, %v403_v17 }
 0x342   : > { %v396_v22 = vmul.f32 %v388_v20, %v1821_v11  ;;  %1201 = vmatprep.mubr.msk.bf16.mxu1 %vm1542_vm0, %v1541_v0  ;;  %v669_v11 = vand.u32 127, %v666_v16 }
 0x344   : > { %v400_v23 = vadd.f32 %v396_v22, %v392_v21  ;;  %v719_v24 = vpop.permute.xlu1 %718  ;;  %vm670_vm5 = vcmp.le.s32.totalorder %v669_v11, %v667_v27 }
 0x345   : > { %v725_v25 = vsel %vm723_vm4, %v719_v24, 0 }
 0x346   : > { %v404_v26 = vpack.c.bf16 %v400_v23, %v400_v23  ;;  %1200 = vmatpush3.bf16.msra.mxu1 %v725_v25 }
 0x347   : > { %1211 = vmatprep.subr.bf16.mxu1 %v1541_v0 }
 0x348   : > { %1196 = vmatmul.mubr.msk.bf16.vlgmr.msra.gmra.mrb[8].mxu0 %vm472_vm3, %v404_v26 }
 0x349   : > { %1207 = vmatprep.mubr.msk.bf16.mxu0 %vm1542_vm0, %v1541_v0 }
 0x3a9   : > { %v513_v28 = vpop.f32.mrb[0].mxu1 }
 0x3aa   : > { %v673_v29 = vsel %vm670_vm5, %v513_v28, -1e+30  ;;  %v1179_v30 = vpop.f32.mrb[1].mxu1  ;;  %v1327_v28 = vld [vmem:[#allocation7] sm:$0xff]  }
 0x3ab   : > { %v516_v31 = vpop.f32.mrb[2].mxu1  ;;  %v677_v32 = vsel %vm472_vm3, %v673_v29, -inf  ;;  %v1328_v30 = vld [vmem:[#allocation7 + $0x8] sm:$0xff]  }
 0x3ac   : > { %678 = vmax.xlane.f32.xlu0 %v677_v32  ;;  %v1180_v33 = vpop.f32.mrb[3].mxu1 }
 0x410   : > { %v562_v34 = vpop.f32.mrb[4].mxu0 }
 0x411   : > { %v674_v35 = vsel %vm670_vm5, %v562_v34, -1e+30  ;;  %v1185_v36 = vpop.f32.mrb[5].mxu0 }
 0x412   : > { %v565_v37 = vpop.f32.mrb[6].mxu0  ;;  %v680_v38 = vsel %vm472_vm3, %v674_v35, -inf }
 0x413   : > { %681 = vmax.xlane.f32.xlu1 %v680_v38  ;;  %v1186_v39 = vpop.f32.mrb[7].mxu0 }
 0x414   : > { %v611_v40 = vpop.f32.mrb[4].mxu1 }
 0x415   : > { %v675_v41 = vsel %vm670_vm5, %v611_v40, -1e+30  ;;  %v1191_v42 = vpop.f32.mrb[5].mxu1 }
 0x416   : > { %v614_v43 = vpop.f32.mrb[6].mxu1  ;;  %v683_v44 = vsel %vm472_vm3, %v675_v41, -inf }
 0x417   : > { %684 = vmax.xlane.f32.xlu0 %v683_v44  ;;  %v1192_v45 = vpop.f32.mrb[7].mxu1 }
 0x41b   : > { %v660_v46 = vpop.f32.mrb[8].mxu0 }
 0x41c   : > { %v676_v47 = vsel %vm670_vm5, %v660_v46, -1e+30  ;;  %v1197_v48 = vpop.f32.mrb[9].mxu0 }
 0x41d   : > { %v663_v49 = vpop.f32.mrb[10].mxu0  ;;  %v686_v50 = vsel %vm472_vm3, %v676_v47, -inf }
 0x41e   : > { %687 = vmax.xlane.f32.xlu0 %v686_v50  ;;  %v1198_v51 = vpop.f32.mrb[11].mxu0 }
 0x424   : > { %817 = vrot.lane.b32.xlu1 %v356_v52, %s1552_s12 }
 0x428   : > { %866 = vrot.lane.b32.xlu1 %v357_v53, %s1552_s12 }
 0x434   : > { %768 = vrot.lane.b32.xlu0 %v355_v54, %s1552_s12 }
 0x439   : > { %v679_v55 = vpop.xlane.xlu0 %678 }
 0x43a   : > { %v689_v56 = vsub.f32 %v673_v29, %v679_v55 }
 0x43c   : > { %v693_v57 = vmul.f32 1.442695, %v689_v56 }
 0x43e   : > { %1329 = vpow2.f32 %v693_v57 }
 0x448   : > { %v1330_v58 = vpop.eup %1329 }
 0x449   : > { %v713_v59 = vpack.c.bf16 %v1330_v58, %v1330_v58  ;;  %v701_v23 = vsel %vm472_vm3, %v1330_v58, 0.0 }
 0x44b   : > { %1202 = vmatmul.mubr.msk.bf16.vlgmr.msra.gmra.mrb[8].mxu1 %vm472_vm3, %v713_v59 }
 0x44c   : > { %1213 = vmatprep.mubr.msk.bf16.mxu1 %vm1542_vm0, %v1541_v0 }
 0x4a0   : > { %v682_v10 = vpop.xlane.xlu1 %681 }
 0x4a1   : > { %v690_v9 = vsub.f32 %v674_v35, %v682_v10 }
 0x4a3   : > { %v695_v60 = vmul.f32 1.442695, %v690_v9 }
 0x4a4   : > { %v685_v61 = vpop.xlane.xlu0 %684  ;;  %v818_v62 = vpop.permute.xlu1 %817 }
 0x4a5   : > { %1331 = vpow2.f32 %v695_v60  ;;  %v691_v8 = vsub.f32 %v675_v41, %v685_v61  ;;  %v823_v63 = vsel %vm723_vm4, %v818_v62, 0 }
 0x4a6   : > { %1212 = vmatpush3.bf16.msra.mxu1 %v823_v63 }
 0x4a7   : > { %v697_v1 = vmul.f32 1.442695, %v691_v8  ;;  %1223 = vmatprep.subr.bf16.mxu1 %v1541_v0 }
 0x4a8   : > { %v867_v13 = vpop.permute.xlu1 %866 }
 0x4a9   : > { %1333 = vpow2.f32 %v697_v1  ;;  %v872_v17 = vsel %vm723_vm4, %v867_v13, 0 }
 0x4ab   : > { %v688_v2 = vpop.xlane.xlu0 %687 }
 0x4ac   : > { %v692_v3 = vsub.f32 %v676_v47, %v688_v2 }
 0x4ae   : > { %v699_v4 = vmul.f32 1.442695, %v692_v3 }
 0x4af   : > { %v1332_v5 = vpop.eup %1331  ;;  %v769_v6 = vpop.permute.xlu0 %768 }
 0x4b0   : > { %1335 = vpow2.f32 %v699_v4  ;;  %v774_v7 = vsel %vm723_vm4, %v769_v6, 0  ;;  %v704_v12 = vsel %vm472_vm3, %v1332_v5, 0.0  ;;  %v714_v14 = vpack.c.bf16 %v1332_v5, %v1332_v5 }
 0x4b1   : > { %705 = vadd.xlane.f32.xlu0 %v704_v12  ;;  %1206 = vmatpush3.bf16.msra.mxu0 %v774_v7 }
 0x4b2   : > { %1217 = vmatprep.subr.bf16.mxu0 %v1541_v0 }
 0x4b3   : > { %v1334_v15 = vpop.eup %1333 }
 0x4b4   : > { %1208 = vmatmul.mubr.msk.bf16.vlgmr.msra.gmra.mrb[12].mxu0 %vm472_vm3, %v714_v14  ;;  %v707_v18 = vsel %vm472_vm3, %v1334_v15, 0.0  ;;  %v715_v19 = vpack.c.bf16 %v1334_v15, %v1334_v15 }
 0x4b5   : > { %708 = vadd.xlane.f32.xlu1 %v707_v18  ;;  %1218 = vmatpush3.bf16.msra.mxu0 %v872_v17 }
 0x4b6   : > { %1214 = vmatmul.mubr.msk.bf16.vlgmr.msra.gmra.mrb[12].mxu1 %vm472_vm3, %v715_v19  ;;  %1219 = vmatprep.mubr.msk.bf16.mxu0 %vm1542_vm0, %v1541_v0 }
 0x4b7   : > { %1227 = vmatprep.mubr.msk.bf16.mxu1 %vm1542_vm0, %v1541_v0  ;;  %1224 = vmatpush3.bf16.msra.mxu1 %v1327_v28 }
 0x4b8   : > { %1225 = vmatprep.subr.bf16.mxu1 %v1541_v0 }
 0x4ba   : > { %v1336_v20 = vpop.eup %1335 }
 0x4bb   : > { %v710_v21 = vsel %vm472_vm3, %v1336_v20, 0.0  ;;  %v716_v22 = vpack.c.bf16 %v1336_v20, %v1336_v20  ;;  %1226 = vmatpush3.bf16.msra.mxu1 %v1328_v30 }
 0x4bc   : > { %711 = vadd.xlane.f32.xlu0 %v710_v21 }
 0x4bd   : > { %1220 = vmatmul.mubr.msk.bf16.vlgmr.msra.gmra.mrb[16].mxu0 %vm472_vm3, %v716_v22 }
 0x4c0   : > { %702 = vadd.xlane.f32.xlu0 %v701_v23 }
 0x51e   : > { %v761_v24 = vpop.f32.mrb[8].mxu1 }
 0x51f   : > { %v1203_v25 = vpop.f32.mrb[9].mxu1 }
 0x520   : > { %v764_v26 = vpop.f32.mrb[10].mxu1 }
 0x521   : > { %v1204_v16 = vpop.f32.mrb[11].mxu1 }
 0x53e   : > { %v706_v27 = vpop.xlane.xlu0 %705 }
 0x53f   : > { %1337 = vrcp.f32 %v706_v27 }
 0x542   : > { %v709_v11 = vpop.xlane.xlu1 %708 }
 0x543   : > { %1339 = vrcp.f32 %v709_v11 }
 0x549   : > { %v712_v29 = vpop.xlane.xlu0 %711  ;;  %v1338_v31 = vpop.eup %1337 }
 0x54a   : > { %1341 = vrcp.f32 %v712_v29 }
 0x54d   : > { %v1340_v35 = vpop.eup %1339  ;;  %v703_v48 = vpop.xlane.xlu0 %702 }
 0x54e   : > { %1343 = vrcp.f32 %v703_v48 }
 0x554   : > { %v1342_v0 = vpop.eup %1341 }
 0x558   : > { %v1344_v49 = vpop.eup %1343 }
 0x559   : > { %v918_v51 = vmul.f32 %v1344_v49, %v761_v24 }
 0x587   : > { %v810_v32 = vpop.f32.mrb[12].mxu0 }
 0x588   : > { %v919_v33 = vmul.f32 %v1338_v31, %v810_v32  ;;  %v1209_v34 = vpop.f32.mrb[13].mxu0 }
 0x589   : > { %v813_v36 = vpop.f32.mrb[14].mxu0  ;;  %v859_v37 = vpop.f32.mrb[12].mxu1 }
 0x58a   : > { %v920_v38 = vmul.f32 %v1340_v35, %v859_v37  ;;  %v1215_v39 = vpop.f32.mrb[13].mxu1  ;;  %923 = vrot.lane.b32.xlu1 %v919_v33, %s1553_s23  ;;  %v1210_v40 = vpop.f32.mrb[15].mxu0 }
 0x58b   : > { %v862_v41 = vpop.f32.mrb[14].mxu1 }
 0x58c   : > { %v1216_v42 = vpop.f32.mrb[15].mxu1  ;;  %927 = vrot.lane.b32.xlu0 %v920_v38, %s1554_s27 }
 0x590   : > { %v908_v43 = vpop.f32.mrb[16].mxu0 }
 0x591   : > { %v921_v44 = vmul.f32 %v1342_v0, %v908_v43  ;;  %v1221_v45 = vpop.f32.mrb[17].mxu0 }
 0x592   : > { %v911_v46 = vpop.f32.mrb[18].mxu0 }
 0x593   : > { %931 = vrot.lane.b32.xlu1 %v921_v44, %s1555_s29  ;;  %v1222_v47 = vpop.f32.mrb[19].mxu0 }
 0x5fc   : > { %v924_v50 = vpop.permute.xlu1 %923 }
 0x5fd   : > { %v934_v52 = vsel %vm472_vm3, %v918_v51, %v924_v50 }
 0x5fe   : > { %v928_v53 = vpop.permute.xlu0 %927 }
 0x5ff   : > { %v936_v54 = vsel %vm935_vm6, %v934_v52, %v928_v53 }
 0x605   : > { %v932_v55 = vpop.permute.xlu1 %931 }
 0x606   : > { %v938_v56 = vsel %vm937_vm7, %v936_v54, %v932_v55 }
 0x607   : > { %v939_v57 = vpack.c.bf16 %v938_v56, %v938_v56 }
 0x609   : > { %1228 = vmatmul.mubr.msk.bf16.vlgmr.msra.gmra.mrb[16].mxu1 %vm300_vm1, %v939_v57 }
 0x6dc   : > { %v993_v58 = vpop.f32.mrb[16].mxu1 }
 0x6dd   : > { %999 = vst.msk [vmem:[%s281_s11] sm:$0xff] %vm300_vm1, %v993_v58  ;;  %v1229_v59 = vpop.f32.mrb[17].mxu1 }
 0x6de   : > { %v996_v10 = vpop.f32.mrb[18].mxu1 }
 0x6df   : > { %1472 = shalt.err (!%p1469_p4)
}
 0x6e0   : > { %s1473_s6 = scalar_lea.hbm %s1940_s7, 128  ;;  %s1477_s27 = scalar_lea.hbm %s1990_s5, 256 }
 0x6e1   : > { %p1474_p0 = scmp.ne.s32.totalorder %s1940_s7, %s1473_s6  ;;  %p1478_p11 = scmp.lt.u32.totalorder %s1940_s7, %s1990_s5 }
 0x6e2   : > { %p1479_p13 = scmp.lt.u32.totalorder %s1477_s27, %s1473_s6  ;;  %p1481_p10 = scmp.lt.u32.totalorder %s1473_s6, %s1940_s7 }
 0x6e3   : > { %p1475_p9 = pnand %p1474_p0, %p1732_p5 }
 0x6e4   : > { %p1480_p6 = por %p1479_p13, %p1478_p11 }
 0x6e5   : > { %p1476_p8 = pneg %p1475_p9 }
 0x6e6   : > { %p1482_p3 = por %p1481_p10, %p1480_p6 }
 0x6e8   : > { %p1483_p7 = pnand %p1482_p3, %p1476_p8 }
 0x6ea   : > { %1486 = shalt.err (!%p1483_p7)
}
 0x6eb   : > { %1245 = dma.vmem_to_hbm [thread:$0]  (%p1732_p5), %s1942_s13, 128, %s1940_s7, %s1001_s8   ;;  %v1230_v9 = vpop.f32.mrb[19].mxu1 }
 0x6ec PF: > { %s1026_s26 = sand.u32 1, %s1521_s18   ;;  %p2008_p12 = scmp.ne.s32.totalorder %s1995_s25, 0 }
 0x6ed   : > { %p2009_p2 = scmp.ge.s32.totalorder %s1533_s21, 2  ;;  %s1027_s11 = scalar_lea.sflag [#allocation4], %s1026_s26 }
 0x6ef   : > { %p1262_p1 = pnand %p2009_p2, %p2008_p12 }
 0x6f1   : > { %1516 = dma.done.wait (!%p1262_p1), %s1027_s11, 128  }
 0x6f2   : > { %1518 = vsyncadd (!%p1262_p1), %s1027_s11, 4294967168  ;;  %p20_p4 = scmp.ge.s32.totalorder %s1718_s14, 4   ;;  %s2010_s18 = smov %s1525_s19 }
 0x6f3   : > { %s2011_s19 = smov %s1529_s20  ;;  %s2012_s20 = smov %s1728_s28 }
 0x6f4   : > { %s2013_s21 = smov %s1718_s14  ;;  %22 = sbr.rel (!%p20_p4) target bundleno = 7 (0x7), region = 97 }
 0x6fb   :  { %1032 = vsyncpa [#allocation3], 1 }
 0x6fc   :  { %1034 = vsyncpa [#allocation3 + $0x1], 1 }
 0x6fd   :  { %1035 = vsyncpa [#allocation6], 1 }
 0x6fe   :  { %1036 = vsyncpa [#allocation9], 1 }
 0x6ff   :  { %1037 = vsyncpa [#allocation4], 1 }
 0x700   :  { %1039 = vsyncpa [#allocation4 + $0x1], 1 }

</bundles_post_ra>
